<compile_context>
chip_gen: v6e
topology: v6e:2x2x1
jax: 0.10.0
libtpu: 0.0.40
codegen_flags: <defaults>
</compile_context>

<pallas_src>
import functools

import jax
import jax.numpy as jnp
import numpy as np
from jax.experimental import pallas as pl
from jax.experimental.pallas import tpu as pltpu


# ----------------------------------------------------------------------------
# Helpers
# ----------------------------------------------------------------------------
def _round_up(v, m):
    return ((v + m - 1) // m) * m


def _pick_npad_tile(n, max_tile=1024):
    """Pad node count and pick the square grid tile.

    - tiny graphs (<= 512 nodes): one tile covering the whole padded graph
      (block dims then equal the full array dims, so no (8,128) issue).
    - larger graphs: tile is a multiple of 128, capped at max_tile, chosen so
      there are at least 2 row tiles (keeps both v7x TensorCores busy on the
      "parallel" row axis).
    """
    npad = _round_up(n, 8)
    if npad <= 512:
        return npad, npad
    tile = min(max_tile, _round_up(pl.cdiv(npad, 2), 128))
    npad = _round_up(npad, tile)
    return npad, tile


def _pad2(a, rows, cols):
    return jnp.pad(a, ((0, rows - a.shape[0]), (0, cols - a.shape[1])))


# ----------------------------------------------------------------------------
# Fused SAGE layer kernel
#   grid = (row tiles over target nodes, reduction tiles over source nodes)
#   acc_ref accumulates  A_counts[rows, :] @ X  across the reduction axis.
#   At the last reduction step:
#     h = (acc * inv_deg) @ Wl + X[rows] @ Wr + b   (+ ReLU)
#   and optionally the fused per-node classifier projection h @ [Wc_src|Wc_dst]
#   is emitted instead of h.
# ----------------------------------------------------------------------------
def sage_layer_kernel(a_ref, xk_ref, xr_ref, inv_deg_ref, wl_ref, wr_ref,
                      b_ref, *rest, apply_relu, project, compute_dtype):
    if project:
        wsd_ref, out_ref, acc_ref = rest
    else:
        out_ref, acc_ref = rest

    k = pl.program_id(1)

    @pl.when(k == 0)
    def _():
        acc_ref[...] = jnp.zeros_like(acc_ref)

    # O(N^2)-traffic matmul on edge counts: A is int8 in HBM, upcast to the
    # MXU dtype (bf16 default) here; the cast is VPU work hidden under the
    # A-tile DMA.  f32 accumulation.
    a_blk = a_ref[...].astype(jnp.float32).astype(compute_dtype)
    xk_blk = xk_ref[...].astype(compute_dtype)
    acc_ref[...] += jnp.dot(a_blk, xk_blk, preferred_element_type=jnp.float32)

    @pl.when(k == pl.num_programs(1) - 1)
    def _():
        # Mean normalization folded in here with exact f32 1/deg.
        agg = acc_ref[...] * inv_deg_ref[...]
        h = (jnp.dot(agg, wl_ref[...], preferred_element_type=jnp.float32)
             + jnp.dot(xr_ref[...].astype(jnp.float32), wr_ref[...],
                       preferred_element_type=jnp.float32)
             + b_ref[...])
        if apply_relu:
            h = jnp.maximum(h, 0.0)
        if project:
            # Fused classifier halves: one matmul, one lane-dense output DMA.
            out_ref[...] = jnp.dot(
                h, wsd_ref[...],
                preferred_element_type=jnp.float32).astype(out_ref.dtype)
        else:
            out_ref[...] = h.astype(out_ref.dtype)


def sage_layer(a_counts, x, inv_deg, wl, wr, b, *, apply_relu, wsd=None,
               tile, out_dtype=jnp.float32, compute_dtype=jnp.bfloat16):
    npad = a_counts.shape[0]
    f = x.shape[1]
    c = wl.shape[1]
    tm = tk = tile
    grid = (npad // tm, npad // tk)

    in_specs = [
        pl.BlockSpec((tm, tk), lambda i, k: (i, k)),   # A counts (int8) tile
        pl.BlockSpec((tk, f), lambda i, k: (k, 0)),    # X source rows (reduction)
        pl.BlockSpec((tm, f), lambda i, k: (i, 0)),    # X target rows (root term)
        pl.BlockSpec((tm, 1), lambda i, k: (i, 0)),    # 1/deg (exact f32)
        pl.BlockSpec((f, c), lambda i, k: (0, 0)),     # Wl
        pl.BlockSpec((f, c), lambda i, k: (0, 0)),     # Wr
        pl.BlockSpec((1, c), lambda i, k: (0, 0)),     # bias
    ]
    inputs = [a_counts, x, x, inv_deg, wl, wr, b]

    if wsd is None:
        out_cols = c
    else:
        out_cols = wsd.shape[1]
        in_specs.append(pl.BlockSpec((c, out_cols), lambda i, k: (0, 0)))
        inputs.append(wsd)

    kernel = functools.partial(sage_layer_kernel,
                               apply_relu=apply_relu,
                               project=wsd is not None,
                               compute_dtype=compute_dtype)
    return pl.pallas_call(
        kernel,
        out_shape=jax.ShapeDtypeStruct((npad, out_cols), out_dtype),
        grid_spec=pltpu.PrefetchScalarGridSpec(
            num_scalar_prefetch=0,
            grid=grid,
            in_specs=in_specs,
            out_specs=pl.BlockSpec((tm, out_cols), lambda i, k: (i, 0)),
            scratch_shapes=[pltpu.VMEM((tm, f), jnp.float32)],
        ),
        compiler_params=pltpu.CompilerParams(
            dimension_semantics=("parallel", "arbitrary")),
    )(*inputs)


# ----------------------------------------------------------------------------
# Full model forward (conv1 -> relu -> conv2 fused with per-node classifier
# projections -> per-edge gather + bias)
# ----------------------------------------------------------------------------
def model_forward(params, x, edge_index, *, max_tile=1024,
                  compute_dtype=jnp.bfloat16, h_dtype=jnp.bfloat16):
    n, in_ch = x.shape
    hidden = params['Wl1'].shape[1]
    out_ch = params['Wc'].shape[1]

    f0 = _round_up(in_ch, 128)       # padded input feature dim (lane-dense)
    c = _round_up(hidden, 128)       # padded hidden dim
    o_half = _round_up(out_ch, 64)   # so the fused [src|dst] proj is 128-wide
    npad, tile = _pick_npad_tile(n, max_tile)

    src, dst = edge_index[0], edge_index[1]   # row (source), col (target)

    # Unnormalized edge-count adjacency shipped as int8 (exact small ints,
    # half the bytes of bf16).  Matches PyG scatter-mean incl. multigraphs.
    # TODO(synk): overflows if any (src,dst) pair has >127 parallel edges.
    a_counts = jnp.zeros((npad, npad), jnp.int8).at[dst, src].add(1)
    deg = jnp.zeros((npad,), jnp.float32).at[dst].add(1.0)
    inv_deg = (1.0 / jnp.maximum(deg, 1.0)).reshape(npad, 1)

    xp = _pad2(x.astype(jnp.float32), npad, f0)
    wl1 = _pad2(params['Wl1'], f0, c)
    wr1 = _pad2(params['Wr1'], f0, c)
    b1 = _pad2(params['b1'], 1, c)
    wl2 = _pad2(params['Wl2'], c, c)
    wr2 = _pad2(params['Wr2'], c, c)
    b2 = _pad2(params['b2'], 1, c)
    # Fused classifier weights: [Wc_src | Wc_dst] applied per NODE in layer 2.
    wsd = jnp.concatenate([_pad2(params['Wc'][:hidden], c, o_half),
                           _pad2(params['Wc'][hidden:], c, o_half)], axis=1)

    # Layer 1: conv1 + ReLU; activations emitted in h_dtype (bf16 default)
    # to halve the writeback and the re-read source stream of layer 2.
    h1 = sage_layer(a_counts, xp, inv_deg, wl1, wr1, b1, apply_relu=True,
                    tile=tile, out_dtype=h_dtype, compute_dtype=compute_dtype)
    # Layer 2: conv2 fused with the per-node classifier halves.
    hsd = sage_layer(a_counts, h1, inv_deg, wl2, wr2, b2, apply_relu=False,
                     wsd=wsd, tile=tile, out_dtype=jnp.float32,
                     compute_dtype=compute_dtype)

    hs = hsd[:n, :out_ch]
    hd = hsd[:n, o_half:o_half + out_ch]
    # TODO(synk): per-edge gather + add + bias (O(E*out_ch), tiny) is left to
    # XLA; a Pallas Element-gather kernel is not worth a dispatch here.
    return hs[src] + hd[dst] + params['bc']


# ----------------------------------------------------------------------------
# Pure-JAX edge-list reference (PyG-equivalent semantics) for validation
# ----------------------------------------------------------------------------
def sage_conv_ref(x, wl, wr, b, edge_index, n):
    src, dst = edge_index[0], edge_index[1]
    msg = jax.ops.segment_sum(x[src], dst, num_segments=n)
    deg = jax.ops.segment_sum(jnp.ones(src.shape, jnp.float32), dst,
                              num_segments=n)
    agg = msg / jnp.maximum(deg, 1.0)[:, None]
    return agg @ wl + x @ wr + b


def model_ref(params, x, edge_index):
    n = x.shape[0]
    h = jnp.maximum(sage_conv_ref(x, params['Wl1'], params['Wr1'],
                                  params['b1'], edge_index, n), 0.0)
    h = sage_conv_ref(h, params['Wl2'], params['Wr2'], params['b2'],
                      edge_index, n)
    row, col = edge_index[0], edge_index[1]
    edge_emb = jnp.concatenate([h[row], h[col]], axis=-1)
    return edge_emb @ params['Wc'] + params['bc']


# ----------------------------------------------------------------------------
# Deterministic init + test
# ----------------------------------------------------------------------------
def glorot(key, shape):
    fan_in, fan_out = shape[0], shape[1]
    lim = jnp.sqrt(6.0 / (fan_in + fan_out))
    return jax.random.uniform(key, shape, jnp.float32, -lim, lim)


if __name__ == "__main__":
    N, in_ch, hidden, n_classes = 8, 4, 32, 2

    key = jax.random.PRNGKey(0)
    ks = jax.random.split(key, 8)

    params = {
        'Wl1': glorot(ks[0], (in_ch, hidden)),
        'Wr1': glorot(ks[1], (in_ch, hidden)),
        'b1':  0.1 * jax.random.normal(ks[2], (1, hidden), jnp.float32),
        'Wl2': glorot(ks[3], (hidden, hidden)),
        'Wr2': glorot(ks[4], (hidden, hidden)),
        'b2':  0.1 * jax.random.normal(ks[5], (1, hidden), jnp.float32),
        'Wc':  glorot(ks[6], (2 * hidden, n_classes)),
        'bc':  0.1 * jax.random.normal(ks[7], (1, n_classes), jnp.float32),
    }

    # Node features and a small deterministic directed graph.  The last two
    # edges duplicate existing ones (multigraph) to exercise multiplicity
    # handling in the mean aggregation.
    x = jax.random.normal(jax.random.PRNGKey(1), (N, in_ch), jnp.float32)
    i = jnp.arange(N, dtype=jnp.int32)
    src = jnp.concatenate([i, i, jnp.array([0, 3], jnp.int32)])
    dst = jnp.concatenate([(i + 1) % N, (i + 3) % N,
                           jnp.array([1, 6], jnp.int32)])
    edge_index = jnp.stack([src, dst])            # [2, E], E = 18

    ref = model_ref(params, x, edge_index)

    # Full-f32 in-kernel math: tight check of kernel semantics
    # (int8 counts + f32 inv_deg are exact).
    out_f32 = jax.block_until_ready(
        model_forward(params, x, edge_index,
                      compute_dtype=jnp.float32, h_dtype=jnp.float32))
    np.testing.assert_allclose(np.asarray(out_f32), np.asarray(ref),
                               rtol=1e-3, atol=1e-3)

    # Default perf config (bf16 aggregation matmul, bf16 h1): looser tolerance.
    out_bf16 = jax.block_until_ready(
        model_forward(params, x, edge_index))
    np.testing.assert_allclose(np.asarray(out_bf16), np.asarray(ref),
                               rtol=5e-2, atol=5e-2)

    print("KERNEL_OK")
</pallas_src>

<mosaic_0001>
module attributes {stable_mosaic.version = 11 : i64} {
  func.func @sage_layer_kernel(%arg0: i32, %arg1: i32, %arg2: memref<8x8xi8, #tpu.memory_space<vmem>>, %arg3: memref<8x128xf32, #tpu.memory_space<vmem>>, %arg4: memref<8x128xf32, #tpu.memory_space<vmem>>, %arg5: memref<8x1xf32, #tpu.memory_space<vmem>>, %arg6: memref<128x128xf32, #tpu.memory_space<vmem>>, %arg7: memref<128x128xf32, #tpu.memory_space<vmem>>, %arg8: memref<1x128xf32, #tpu.memory_space<vmem>>, %arg9: memref<8x128xf32, #tpu.memory_space<vmem>>, %arg10: memref<8x128xf32, #tpu.memory_space<vmem>>) attributes {dimension_semantics = [#tpu.dimension_semantics<parallel>, #tpu.dimension_semantics<arbitrary>], iteration_bounds = array<i64: 1, 1>, scalar_prefetch = 0 : i64, scratch_operands = 1 : i64, tpu.core_type = #tpu.core_type<tc>, window_params = [{transform_indices = @transform_0, window_bounds = array<i64: 8, 8>}, {transform_indices = @transform_1, window_bounds = array<i64: 8, 128>}, {transform_indices = @transform_2, window_bounds = array<i64: 8, 128>}, {transform_indices = @transform_3, window_bounds = array<i64: 8, 1>}, {pipeline_mode = #tpu.pipeline_mode<synchronous>, transform_indices = @transform_4, window_bounds = array<i64: 128, 128>}, {pipeline_mode = #tpu.pipeline_mode<synchronous>, transform_indices = @transform_5, window_bounds = array<i64: 128, 128>}, {pipeline_mode = #tpu.pipeline_mode<synchronous>, transform_indices = @transform_6, window_bounds = array<i64: 1, 128>}, {transform_indices = @transform_7, window_bounds = array<i64: 8, 128>}]} {
    %c0_i32 = arith.constant 0 : i32
    %0 = arith.cmpi eq, %arg1, %c0_i32 : i32
    %1 = arith.extui %0 : i1 to i32
    %c0_i32_0 = arith.constant 0 : i32
    %2 = arith.cmpi ne, %1, %c0_i32_0 : i32
    scf.if %2 {
      %cst_10 = arith.constant 0.000000e+00 : f32
      %13 = vector.broadcast %cst_10 : f32 to vector<8x128xf32>
      %c0_11 = arith.constant 0 : index
      %c0_12 = arith.constant 0 : index
      %14 = vector.load %arg10[%c0_11, %c0_12] : memref<8x128xf32, #tpu.memory_space<vmem>>, vector<8x128xf32>
      tpu.vector_store %arg10[%c0_11, %c0_12], %13 {strides = array<i32>} : memref<8x128xf32, #tpu.memory_space<vmem>>, vector<8x128xf32>,
    } else {
    }
    %c0 = arith.constant 0 : index
    %c0_1 = arith.constant 0 : index
    %3 = vector.load %arg2[%c0, %c0_1] : memref<8x8xi8, #tpu.memory_space<vmem>>, vector<8x8xi8>
    %4 = arith.sitofp %3 : vector<8x8xi8> to vector<8x8xf32>
    %c0_2 = arith.constant 0 : index
    %c0_3 = arith.constant 0 : index
    %5 = vector.load %arg3[%c0_2, %c0_3] : memref<8x128xf32, #tpu.memory_space<vmem>>, vector<8x128xf32>
    %c0_4 = arith.constant 0 : index
    %c0_5 = arith.constant 0 : index
    %6 = vector.load %arg10[%c0_4, %c0_5] : memref<8x128xf32, #tpu.memory_space<vmem>>, vector<8x128xf32>
    %cst = arith.constant dense<0.000000e+00> : vector<8x128xf32>
    %7 = tpu.matmul %4, %5, %cst {dimension_numbers = #tpu.dot_dimension_numbers<[1], [0], [0], [1], [0, 0, 1, 1], [], []>} : vector<8x8xf32>, vector<8x128xf32>, vector<8x128xf32> -> vector<8x128xf32>
    %8 = arith.addf %6, %7 : vector<8x128xf32>
    %c0_6 = arith.constant 0 : index
    %c0_7 = arith.constant 0 : index
    %9 = vector.load %arg10[%c0_6, %c0_7] : memref<8x128xf32, #tpu.memory_space<vmem>>, vector<8x128xf32>
    tpu.vector_store %arg10[%c0_6, %c0_7], %8 {strides = array<i32>} : memref<8x128xf32, #tpu.memory_space<vmem>>, vector<8x128xf32>,
    %c0_i32_8 = arith.constant 0 : i32
    %10 = arith.cmpi eq, %arg1, %c0_i32_8 : i32
    %11 = arith.extui %10 : i1 to i32
    %c0_i32_9 = arith.constant 0 : i32
    %12 = arith.cmpi ne, %11, %c0_i32_9 : i32
    scf.if %12 {
      %c0_10 = arith.constant 0 : index
      %c0_11 = arith.constant 0 : index
      %13 = vector.load %arg10[%c0_10, %c0_11] : memref<8x128xf32, #tpu.memory_space<vmem>>, vector<8x128xf32>
      %c0_12 = arith.constant 0 : index
      %c0_13 = arith.constant 0 : index
      %14 = vector.load %arg5[%c0_12, %c0_13] : memref<8x1xf32, #tpu.memory_space<vmem>>, vector<8x1xf32>
      %15 = vector.broadcast %14 : vector<8x1xf32> to vector<8x128xf32>
      %16 = arith.mulf %13, %15 : vector<8x128xf32>
      %c0_14 = arith.constant 0 : index
      %c0_15 = arith.constant 0 : index
      %17 = vector.load %arg6[%c0_14, %c0_15] : memref<128x128xf32, #tpu.memory_space<vmem>>, vector<128x128xf32>
      %cst_16 = arith.constant dense<0.000000e+00> : vector<8x128xf32>
      %18 = tpu.matmul %16, %17, %cst_16 {dimension_numbers = #tpu.dot_dimension_numbers<[1], [0], [0], [1], [0, 0, 1, 1], [], []>} : vector<8x128xf32>, vector<128x128xf32>, vector<8x128xf32> -> vector<8x128xf32>
      %c0_17 = arith.constant 0 : index
      %c0_18 = arith.constant 0 : index
      %19 = vector.load %arg4[%c0_17, %c0_18] : memref<8x128xf32, #tpu.memory_space<vmem>>, vector<8x128xf32>
      %c0_19 = arith.constant 0 : index
      %c0_20 = arith.constant 0 : index
      %20 = vector.load %arg7[%c0_19, %c0_20] : memref<128x128xf32, #tpu.memory_space<vmem>>, vector<128x128xf32>
      %cst_21 = arith.constant dense<0.000000e+00> : vector<8x128xf32>
      %21 = tpu.matmul %19, %20, %cst_21 {dimension_numbers = #tpu.dot_dimension_numbers<[1], [0], [0], [1], [0, 0, 1, 1], [], []>} : vector<8x128xf32>, vector<128x128xf32>, vector<8x128xf32> -> vector<8x128xf32>
      %22 = arith.addf %18, %21 : vector<8x128xf32>
      %c0_22 = arith.constant 0 : index
      %c0_23 = arith.constant 0 : index
      %23 = vector.load %arg8[%c0_22, %c0_23] : memref<1x128xf32, #tpu.memory_space<vmem>>, vector<1x128xf32>
      %24 = vector.broadcast %23 : vector<1x128xf32> to vector<8x128xf32>
      %25 = arith.addf %22, %24 : vector<8x128xf32>
      %cst_24 = arith.constant 0.000000e+00 : f32
      %26 = vector.broadcast %cst_24 : f32 to vector<8x128xf32>
      %27 = arith.maximumf %25, %26 : vector<8x128xf32>
      %c0_25 = arith.constant 0 : index
      %c0_26 = arith.constant 0 : index
      %28 = vector.load %arg9[%c0_25, %c0_26] : memref<8x128xf32, #tpu.memory_space<vmem>>, vector<8x128xf32>
      tpu.vector_store %arg9[%c0_25, %c0_26], %27 {strides = array<i32>} : memref<8x128xf32, #tpu.memory_space<vmem>>, vector<8x128xf32>,
    } else {
    }
    return
  }
  func.func @transform_0(%arg0: i32, %arg1: i32) -> (i32, i32) {
    %c0_i32 = arith.constant 0 : i32
    return %arg0, %arg1 : i32, i32
  }
  func.func @transform_1(%arg0: i32, %arg1: i32) -> (i32, i32) {
    %c0_i32 = arith.constant 0 : i32
    %c0_i32_0 = arith.constant 0 : i32
    return %arg1, %c0_i32 : i32, i32
  }
  func.func @transform_2(%arg0: i32, %arg1: i32) -> (i32, i32) {
    %c0_i32 = arith.constant 0 : i32
    %c0_i32_0 = arith.constant 0 : i32
    return %arg0, %c0_i32 : i32, i32
  }
  func.func @transform_3(%arg0: i32, %arg1: i32) -> (i32, i32) {
    %c0_i32 = arith.constant 0 : i32
    %c0_i32_0 = arith.constant 0 : i32
    return %arg0, %c0_i32 : i32, i32
  }
  func.func @transform_4(%arg0: i32, %arg1: i32) -> (i32, i32) {
    %c0_i32 = arith.constant 0 : i32
    %c0_i32_0 = arith.constant 0 : i32
    %c0_i32_1 = arith.constant 0 : i32
    return %c0_i32, %c0_i32_0 : i32, i32
  }
  func.func @transform_5(%arg0: i32, %arg1: i32) -> (i32, i32) {
    %c0_i32 = arith.constant 0 : i32
    %c0_i32_0 = arith.constant 0 : i32
    %c0_i32_1 = arith.constant 0 : i32
    return %c0_i32, %c0_i32_0 : i32, i32
  }
  func.func @transform_6(%arg0: i32, %arg1: i32) -> (i32, i32) {
    %c0_i32 = arith.constant 0 : i32
    %c0_i32_0 = arith.constant 0 : i32
    %c0_i32_1 = arith.constant 0 : i32
    return %c0_i32, %c0_i32_0 : i32, i32
  }
  func.func @transform_7(%arg0: i32, %arg1: i32) -> (i32, i32) {
    %c0_i32 = arith.constant 0 : i32
    %c0_i32_0 = arith.constant 0 : i32
    return %arg0, %c0_i32 : i32, i32
  }
}

</mosaic_0001>

<bundles_post_ra>
// kernel: tpu_custom_call.1
= control target key start
LH: loop header
LB: loop body
LE: loop exit
PB: predicated region body
PF: predicated region fallthrough
CT: control target
= control target key end

     0   :  { %12 = vsyncpa [#allocation4], 0  ;;  %s683_s0 = inlined_call_operand.vmem [shape: s8[8,8], index: 0, kind: input, shape index: {}]   ;;  %s684_s1 = inlined_call_operand.vmem [shape: f32[8,128], index: 1, kind: input, shape index: {}]   ;;  %s685_s2 = inlined_call_operand.hbm [shape: f32[8,128], index: 2, kind: input, shape index: {}]   ;;  %s686_s3 = inlined_call_operand.vmem [shape: f32[8,1], index: 3, kind: input, shape index: {}]   ;;  %s687_s4 = inlined_call_operand.hbm [shape: f32[128,128], index: 4, kind: input, shape index: {}]   ;;  %s688_s5 = inlined_call_operand.hbm [shape: f32[128,128], index: 5, kind: input, shape index: {}]   ;;  %s689_s6 = inlined_call_operand.vmem [shape: f32[1,128], index: 6, kind: input, shape index: {}]   ;;  %s690_s7 = inlined_call_operand.hbm [shape: f32[8,128], index: 7, kind: output, shape index: {}]  }
   0x1   :  { %13 = vsyncpa [#allocation7], 0 }
   0x2   :  { %14 = vsyncpa [#allocation5], 0  ;;  %s571_s24 = smov [#allocation6]  }
   0x3   :  { %s36_s25 = sshll.u32 %s571_s24, 4  ;;  %s37_s25 = int_to_ptr.vmem [resolvable:$true] %s36_s25 }
   0x4   :  { %s493_s26 = scalar_lea.vmem %s37_s25, 2048  ;;  %p498_p1 = scmp.lt.s32.totalorder %s37_s25, %s37_s25 }
   0x5   :  { %p494_p0 = scmp.ne.s32.totalorder %s37_s25, %s493_s26  ;;  %p499_p2 = scmp.lt.s32.totalorder %s493_s26, %s493_s26 }
   0x7   :  { %p500_p3 = por %p499_p2, %p498_p1 }
   0x9   :  { %p501_p4 = pnand %p500_p3, %p494_p0 }
   0xb   :  { %504 = shalt.err (!%p501_p4)
}
   0xc   :  { %s572_s27 = smov 128   ;;  %s573_s28 = smov 8  }
   0xd   :  { %42 = dma.hbm_to_vmem [thread:$0]  %s687_s4, 2048, %s37_s25, [#allocation7], %s572_s27, %s572_s27, %s573_s28  }
   0xe   :  { %s574_s8 = smov [#allocation3]   ;;  %s575_s10 = smov [#allocation8]  }
   0xf   :  { %s25_s9 = sshll.u32 %s574_s8, 4  ;;  %s48_s11 = sshll.u32 %s575_s10, 4  ;;  %s26_s9 = int_to_ptr.vmem [resolvable:$true] %s25_s9  ;;  %s49_s11 = int_to_ptr.vmem [resolvable:$true] %s48_s11 }
  0x10   :  { %s513_s12 = scalar_lea.vmem %s26_s9, 128  ;;  %p518_p6 = scmp.lt.s32.totalorder %s26_s9, %s26_s9 }
  0x11   :  { %p514_p5 = scmp.ne.s32.totalorder %s26_s9, %s513_s12  ;;  %p519_p7 = scmp.lt.s32.totalorder %s513_s12, %s513_s12 }
  0x13   :  { %p520_p8 = por %p519_p7, %p518_p6 }
  0x15   :  { %p521_p9 = pnand %p520_p8, %p514_p5 }
  0x17   :  { %524 = shalt.err (!%p521_p9)
}
  0x18   :  { %28 = dma.hbm_to_vmem [thread:$0]  %s685_s2, 128, %s26_s9, [#allocation4]  }
  0x19   :  { %s533_s15 = scalar_lea.vmem %s49_s11, 2048  ;;  %p538_p11 = scmp.lt.s32.totalorder %s49_s11, %s49_s11 }
  0x1a   :  { %p534_p10 = scmp.ne.s32.totalorder %s49_s11, %s533_s15  ;;  %p539_p12 = scmp.lt.s32.totalorder %s533_s15, %s533_s15 }
  0x1c   :  { %p540_p13 = por %p539_p12, %p538_p11 }
  0x1e   :  { %p541_p0 = pnand %p540_p13, %p534_p10 }
  0x20   :  { %544 = shalt.err (!%p541_p0)
}
  0x21   :  { %54 = dma.hbm_to_vmem [thread:$0]  %s688_s5, 2048, %s49_s11, [#allocation7], %s572_s27, %s572_s27, %s573_s28  }
  0x22   :  { %565 = dma.done.wait [#allocation4], 128  }
  0x23   :  { %566 = vsyncadd [#allocation4], 4294967168 }
  0x24   :  { %567 = dma.done.wait [#allocation7], 4096  }
  0x25   :  { %568 = vsyncadd [#allocation7], 4294963200  ;;  %v576_v0 = vmov 0.0   ;;  %vm577_vm0 = vmmov 0   ;;  %v578_v1 = vmov 0   ;;  %v74_v2 = vld [vmem:[%s684_s1] sm:$0xff] }
  0x26   :  { %400 = vmatprep.subr.mxu0 %v576_v0  ;;  %402 = vmatprep.mubr.msk.f32.mxu0 %vm577_vm0, %v576_v0  ;;  %v71_v3 = vld [vmem:[%s683_s0] sm:$0x3]  ;;  %v194_v7 = vld [vmem:[#allocation8 + $0x70] sm:$0xff]  ;;  %vm76_vm1 = vcmask 64512   ;;  %v193_v10 = vld [vmem:[#allocation8 + $0x68] sm:$0xff] }
  0x27   :  { %484 = vset.pattern.permute.xlu0 %v578_v1  ;;  %405 = vmatprep.subr.mxu1 %v576_v0  ;;  %v156_v4 = vld [vmem:[%s686_s3] sm:$0xff]  ;;  %v72_v5 = vunpack.c.0.s8 %v71_v3  ;;  %v177_v11 = vld [vmem:[#allocation6 + $0x70] sm:$0xff]  ;;  %v192_v12 = vld [vmem:[#allocation8 + $0x60] sm:$0xff]  ;;  %s579_s3 = smov [#allocation9]  }
  0x28   :  { %437 = vmatprep.mubr.msk.f32.mxu1 %vm577_vm0, %v576_v0  ;;  %401 = vmatpush3.msra.mxu0 %v74_v2  ;;  %v195_v6 = vld [vmem:[#allocation8 + $0x78] sm:$0xff]  ;;  %v176_v13 = vld [vmem:[#allocation6 + $0x68] sm:$0xff]  ;;  %v175_v15 = vld [vmem:[#allocation6 + $0x60] sm:$0xff]  ;;  %s352_s21 = sshll.u32 %s579_s3, 4  ;;  %s353_s21 = int_to_ptr.vmem [resolvable:$true] %s352_s21 }
  0x29   :  { %159 = vperm.xlu0 %484, %v156_v4   ;;  %406 = vmatpush3.msra.mxu1 %v195_v6  ;;  %v73_v8 = vcvt.s32.f32 %v72_v5  ;;  %v178_v9 = vld [vmem:[#allocation6 + $0x78] sm:$0xff]  ;;  %v190_v16 = vld [vmem:[#allocation8 + $0x50] sm:$0xff]  ;;  %v189_v18 = vld [vmem:[#allocation8 + $0x48] sm:$0xff]  ;;  %s545_s22 = scalar_lea.vmem %s353_s21, 128  ;;  %p550_p2 = scmp.lt.s32.totalorder %s353_s21, %s353_s21 }
  0x2a   :  { %440 = vmatprep.subr.mxu0 %v576_v0  ;;  %407 = vmatprep.subr.mxu1 %v576_v0  ;;  %v191_v14 = vld [vmem:[#allocation8 + $0x58] sm:$0xff]  ;;  %v173_v19 = vld [vmem:[#allocation6 + $0x50] sm:$0xff]  ;;  %v188_v20 = vld [vmem:[#allocation8 + $0x40] sm:$0xff]  ;;  %p546_p1 = scmp.ne.s32.totalorder %s353_s21, %s545_s22  ;;  %p551_p3 = scmp.lt.s32.totalorder %s545_s22, %s545_s22 }
  0x2b   :  { %408 = vmatpush3.msra.mxu1 %v194_v7  ;;  %403 = vmatmul.mubr.msk.f32.vlgmr.msra.gmra.mxu0 %vm76_vm1, %v73_v8  ;;  %v174_v17 = vld [vmem:[#allocation6 + $0x58] sm:$0xff]  ;;  %v172_v21 = vld [vmem:[#allocation6 + $0x48] sm:$0xff]  ;;  %v171_v23 = vld [vmem:[#allocation6 + $0x40] sm:$0xff] }
  0x2c   :  { %409 = vmatprep.subr.mxu1 %v576_v0  ;;  %441 = vmatpush3.msra.mxu0 %v178_v9  ;;  %v187_v22 = vld [vmem:[#allocation8 + $0x38] sm:$0xff]  ;;  %v186_v24 = vld [vmem:[#allocation8 + $0x30] sm:$0xff]  ;;  %v185_v26 = vld [vmem:[#allocation8 + $0x28] sm:$0xff]  ;;  %p552_p4 = por %p551_p3, %p550_p2 }
  0x2d   :  { %410 = vmatpush3.msra.mxu1 %v193_v10  ;;  %442 = vmatprep.subr.mxu0 %v576_v0  ;;  %v170_v25 = vld [vmem:[#allocation6 + $0x38] sm:$0xff]  ;;  %v169_v27 = vld [vmem:[#allocation6 + $0x30] sm:$0xff]  ;;  %v184_v28 = vld [vmem:[#allocation8 + $0x20] sm:$0xff] }
  0x2e   :  { %411 = vmatprep.subr.mxu1 %v576_v0  ;;  %443 = vmatpush3.msra.mxu0 %v177_v11  ;;  %v168_v29 = vld [vmem:[#allocation6 + $0x28] sm:$0xff]  ;;  %v183_v30 = vld [vmem:[#allocation8 + $0x18] sm:$0xff]  ;;  %v167_v31 = vld [vmem:[#allocation6 + $0x20] sm:$0xff]  ;;  %p553_p5 = pnand %p552_p4, %p546_p1 }
  0x2f   :  { %412 = vmatpush3.msra.mxu1 %v192_v12  ;;  %444 = vmatprep.subr.mxu0 %v576_v0  ;;  %v182_v32 = vld [vmem:[#allocation8 + $0x10] sm:$0xff]  ;;  %v166_v33 = vld [vmem:[#allocation6 + $0x18] sm:$0xff]  ;;  %v181_v34 = vld [vmem:[#allocation8 + $0x8] sm:$0xff] }
  0x30   :  { %413 = vmatprep.subr.mxu1 %v576_v0  ;;  %445 = vmatpush3.msra.mxu0 %v176_v13  ;;  %v165_v35 = vld [vmem:[#allocation6 + $0x10] sm:$0xff]  ;;  %v180_v36 = vld [vmem:[#allocation8] sm:$0xff]  ;;  %v164_v37 = vld [vmem:[#allocation6 + $0x8] sm:$0xff] }
  0x31   :  { %414 = vmatpush3.msra.mxu1 %v191_v14  ;;  %446 = vmatprep.subr.mxu0 %v576_v0  ;;  %v179_v38 = vld [vmem:[#allocation3] sm:$0xff]  ;;  %v163_v39 = vld [vmem:[#allocation6] sm:$0xff] }
  0x32   :  { %415 = vmatprep.subr.mxu1 %v576_v0  ;;  %447 = vmatpush3.msra.mxu0 %v175_v15  ;;  %v363_v47 = vld [vmem:[%s689_s6] ss:$0 sm:$0xff] }
  0x33   :  { %416 = vmatpush3.msra.mxu1 %v190_v16  ;;  %448 = vmatprep.subr.mxu0 %v576_v0 }
  0x34   :  { %417 = vmatprep.subr.mxu1 %v576_v0  ;;  %449 = vmatpush3.msra.mxu0 %v174_v17 }
  0x35   :  { %418 = vmatpush3.msra.mxu1 %v189_v18  ;;  %450 = vmatprep.subr.mxu0 %v576_v0 }
  0x36   :  { %419 = vmatprep.subr.mxu1 %v576_v0  ;;  %451 = vmatpush3.msra.mxu0 %v173_v19 }
  0x37   :  { %420 = vmatpush3.msra.mxu1 %v188_v20  ;;  %452 = vmatprep.subr.mxu0 %v576_v0 }
  0x38   :  { %421 = vmatprep.subr.mxu1 %v576_v0  ;;  %453 = vmatpush3.msra.mxu0 %v172_v21 }
  0x39   :  { %422 = vmatpush3.msra.mxu1 %v187_v22  ;;  %454 = vmatprep.subr.mxu0 %v576_v0 }
  0x3a   :  { %423 = vmatprep.subr.mxu1 %v576_v0  ;;  %455 = vmatpush3.msra.mxu0 %v171_v23 }
  0x3b   :  { %424 = vmatpush3.msra.mxu1 %v186_v24  ;;  %456 = vmatprep.subr.mxu0 %v576_v0 }
  0x3c   :  { %425 = vmatprep.subr.mxu1 %v576_v0  ;;  %457 = vmatpush3.msra.mxu0 %v170_v25 }
  0x3d   :  { %426 = vmatpush3.msra.mxu1 %v185_v26  ;;  %458 = vmatprep.subr.mxu0 %v576_v0 }
  0x3e   :  { %427 = vmatprep.subr.mxu1 %v576_v0  ;;  %459 = vmatpush3.msra.mxu0 %v169_v27 }
  0x3f   :  { %428 = vmatpush3.msra.mxu1 %v184_v28  ;;  %460 = vmatprep.subr.mxu0 %v576_v0 }
  0x40   :  { %429 = vmatprep.subr.mxu1 %v576_v0  ;;  %461 = vmatpush3.msra.mxu0 %v168_v29 }
  0x41   :  { %430 = vmatpush3.msra.mxu1 %v183_v30  ;;  %462 = vmatprep.subr.mxu0 %v576_v0 }
  0x42   :  { %431 = vmatprep.subr.mxu1 %v576_v0  ;;  %463 = vmatpush3.msra.mxu0 %v167_v31 }
  0x43   :  { %432 = vmatpush3.msra.mxu1 %v182_v32  ;;  %464 = vmatprep.subr.mxu0 %v576_v0 }
  0x44   :  { %433 = vmatprep.subr.mxu1 %v576_v0  ;;  %465 = vmatpush3.msra.mxu0 %v166_v33 }
  0x45   :  { %434 = vmatpush3.msra.mxu1 %v181_v34  ;;  %466 = vmatprep.subr.mxu0 %v576_v0 }
  0x46   :  { %435 = vmatprep.subr.mxu1 %v576_v0  ;;  %467 = vmatpush3.msra.mxu0 %v165_v35 }
  0x47   :  { %436 = vmatpush3.msra.mxu1 %v180_v36  ;;  %468 = vmatprep.subr.mxu0 %v576_v0 }
  0x48   :  { %472 = vmatprep.mubr.msk.f32.mxu0 %vm577_vm0, %v576_v0  ;;  %469 = vmatpush3.msra.mxu0 %v164_v37 }
  0x49   :  { %438 = vmatmul.mubr.f32.vlgmr.msra.gmra.mxu1 %v179_v38  ;;  %470 = vmatprep.subr.mxu0 %v576_v0 }
  0x4a   :  { %471 = vmatpush3.msra.mxu0 %v163_v39 }
  0xa4   :  { %v160_v40 = vpop.permute.xlu0 %159 }
  0xeb   :  { %v146_v41 = vpop.f32.mrf.mxu0 }
  0xec   :  { %v162_v42 = vmul.f32 %v160_v40, %v146_v41 }
  0xed   :  { %v404_v43 = vpop.f32.mrf.mxu0 }
  0xee   :  { %473 = vmatmul.mubr.f32.vlgmr.msra.gmra.mxu0 %v162_v42 }
 0x109   :  { %v262_v44 = vpop.f32.mrf.mxu1 }
 0x10b   :  { %v439_v45 = vpop.f32.mrf.mxu1 }
 0x1ae   :  { %v332_v46 = vpop.f32.mrf.mxu0 }
 0x1af   :  { %v333_v48 = vadd.f32 %v332_v46, %v262_v44 }
 0x1b0   :  { %v474_v49 = vpop.f32.mrf.mxu0 }
 0x1b1   :  { %v343_v50 = vadd.f32 %v363_v47, %v333_v48 }
 0x1b3   :  { %v344_v51 = vmax.f32 %v343_v50, 0.0 }
 0x1b5   :  { %345 = vst [vmem:[#allocation9] sm:$0xff] %v344_v51 }
 0x1b6   :  { %556 = shalt.err (!%p553_p5)
}
 0x1b7   :  { %355 = dma.vmem_to_hbm [thread:$0]  %s353_s21, 128, %s690_s7, [#allocation5]  }
 0x1b8   :  { %569 = dma.done.wait [#allocation5], 128  }
 0x1b9   :  { %570 = vsyncadd [#allocation5], 4294967168 }
 0x1ba   :  { %359 = vsyncpa [#allocation4], 1 }
 0x1bb   :  { %360 = vsyncpa [#allocation7], 1 }
 0x1bc   :  { %361 = vsyncpa [#allocation5], 1 }

</bundles_post_ra>
